<compile_context>
chip_gen: v5e
topology: v5e:2x2
jax: 0.10.0
libtpu: 0.0.40
codegen_flags: <defaults>
</compile_context>

<pallas_src>
import jax
import jax.numpy as jnp
from jax.experimental import pallas as pl
from jax.experimental.pallas import tpu as pltpu

LANE = 128  # TPU lane width: weight-slab width and packed-output chunk stride.


def decoder_rnn_kernel(x_ref, h0_ref, c0_ref, enc_ref, nbr_ref, w_ref, b_ref,
                       out_ref, h_scr, c_scr):
    """One decode step per grid index t; (h, c) carried in VMEM scratch."""
    t = pl.program_id(0)
    I = x_ref.shape[2]
    _, K, H = enc_ref.shape
    W = w_ref.shape[1]                       # == LANE

    @pl.when(t == 0)
    def _init():
        h_scr[...] = h0_ref[...]
        c_scr[...] = c0_ref[...]

    x = x_ref[0]                             # (B, I)
    h_prev = h_scr[...]                      # (B, H)
    c_prev = c_scr[...]                      # (B, H)

    # ---- LSTMCell, fused: gates = [x | h_prev] @ [Wih^T ; Whh^T] + bias -----
    gates = (
        jnp.dot(x, w_ref[0:I, :], preferred_element_type=jnp.float32)
        + jnp.dot(h_prev, w_ref[I:I + H, :], preferred_element_type=jnp.float32)
        + b_ref[0:1, :]
    )                                        # (B, W); lanes 0:4H valid
    i_g = jax.nn.sigmoid(gates[:, 0 * H:1 * H])
    f_g = jax.nn.sigmoid(gates[:, 1 * H:2 * H])
    g_g = jnp.tanh(gates[:, 2 * H:3 * H])
    o_g = jax.nn.sigmoid(gates[:, 3 * H:4 * H])
    c_new = f_g * c_prev + i_g * g_g
    h_new = o_g * jnp.tanh(c_new)            # rnn_output

    h_scr[...] = h_new
    c_scr[...] = c_new

    # ---- fused h1 matmul: lanes [0:K] select logits, [K:9K] neighbor logits,
    #      [9K:9K+H] net[0](h1) (b1 folded into bias row 1) -------------------
    r2 = I + H
    r = (jnp.dot(h_new, w_ref[r2:r2 + H, :], preferred_element_type=jnp.float32)
         + b_ref[1:2, :])                    # (B, W)

    # select attention: softmax over K, weighted sum of encoder_matrix
    sel = r[:, 0:K]
    sel = sel - jnp.max(sel, axis=1, keepdims=True)
    e_sel = jnp.exp(sel)
    beta = e_sel * pl.reciprocal(jnp.sum(e_sel, axis=1, keepdims=True), approx=True)
    ctx = jnp.sum(beta[:, :, None] * enc_ref[...], axis=1)            # (B, H)

    # neighbor attention: softmax over K*8, weighted sum of neighbor matrix
    nbl = r[:, K:9 * K]
    nbl = nbl - jnp.max(nbl, axis=1, keepdims=True)
    e_nb = jnp.exp(nbl)
    nbeta = e_nb * pl.reciprocal(jnp.sum(e_nb, axis=1, keepdims=True), approx=True)
    nctx = jnp.sum(nbeta[:, :, None] * nbr_ref[...], axis=1)          # (B, H)

    # ---- output MLP; later layers are zero-padded (W,W) slab blocks so the
    #      unused lanes stay exactly zero and no value lane-slicing is needed -
    r3 = I + 2 * H
    r4 = r3 + W
    y1 = jnp.where(r > 0, r, 0.01 * r)       # LeakyReLU; only lanes 9K:9K+H feed W2
    y2 = (jnp.dot(y1, w_ref[r3:r3 + W, :], preferred_element_type=jnp.float32)
          + b_ref[2:3, :])
    y2 = jnp.where(y2 > 0, y2, 0.01 * y2)    # lanes 0:H valid, rest exactly 0
    out_full = (jnp.dot(y2, w_ref[r4:r4 + W, :], preferred_element_type=jnp.float32)
                + b_ref[3:4, :])             # lanes 0:I valid, rest exactly 0

    # ---- single lane-dense packed output block (one writeback DMA per step) -
    out_ref[0] = jnp.zeros(out_ref.shape[1:], jnp.float32)
    out_ref[0, :, 0 * LANE:0 * LANE + W] = out_full        # output in lanes 0:I
    out_ref[0, :, 1 * LANE:1 * LANE + H] = ctx
    out_ref[0, :, 2 * LANE:2 * LANE + H] = nctx
    out_ref[0, :, 3 * LANE:3 * LANE + H] = h_new
    out_ref[0, :, 4 * LANE:4 * LANE + H] = c_new


def pack_params(params, input_size, hidden_size, K):
    """Pack all DecoderRNN weights into one 128-lane slab + one bias slab.

    Done once at init (includes the .T transposes and b_ih + b_hh fold) so the
    jitted forward only ships two weight tensors to the kernel.
    """
    I, H = input_size, hidden_size
    assert I % 8 == 0 and H % 8 == 0, "slab row segments must be sublane(8)-aligned"
    assert 4 * H <= LANE and 9 * K + H <= LANE and I <= LANE and H <= LANE, \
        "this packing assumes everything fits a single 128-lane slab"
    W = LANE
    f32 = jnp.float32

    w_slab = jnp.zeros((I + 2 * H + 2 * W, W), f32)
    # rows 0:I          -> x @ Wih^T (gates)
    w_slab = w_slab.at[0:I, 0:4 * H].set(params["w_ih"].T.astype(f32))
    # rows I:I+H        -> h @ Whh^T (gates)
    w_slab = w_slab.at[I:I + H, 0:4 * H].set(params["w_hh"].T.astype(f32))
    # rows I+H:I+2H     -> h1 @ [Wsel^T | Wnb^T | W1^T]
    r2 = I + H
    w_slab = w_slab.at[r2:r2 + H, 0:K].set(params["w_sel"].T.astype(f32))
    w_slab = w_slab.at[r2:r2 + H, K:9 * K].set(params["w_nb"].T.astype(f32))
    w_slab = w_slab.at[r2:r2 + H, 9 * K:9 * K + H].set(params["w1"].T.astype(f32))
    # rows I+2H:I+2H+W  -> zero-padded W2 block (input lanes 9K:9K+H -> lanes 0:H)
    r3 = I + 2 * H
    w_slab = w_slab.at[r3 + 9 * K:r3 + 9 * K + H, 0:H].set(params["w2"].T.astype(f32))
    # rows r3+W:r3+2W   -> zero-padded W3 block (input lanes 0:H -> lanes 0:I)
    r4 = r3 + W
    w_slab = w_slab.at[r4:r4 + H, 0:I].set(params["w3"].T.astype(f32))

    b_slab = jnp.zeros((4, W), f32)
    b_slab = b_slab.at[0, 0:4 * H].set((params["b_ih"] + params["b_hh"]).astype(f32))
    b_slab = b_slab.at[1, 9 * K:9 * K + H].set(params["b1"].astype(f32))
    b_slab = b_slab.at[2, 0:H].set(params["b2"].astype(f32))
    b_slab = b_slab.at[3, 0:I].set(params["b3"].astype(f32))
    return {"w_slab": w_slab, "b_slab": b_slab}


@jax.jit
def decoder_rnn_sequence(x_seq, h0, c0, encoder_matrix, neighbor_matrix, packed_params):
    """Run T decode steps inside one pallas_call (teacher-forced inputs).

    Weights / encoder / neighbor tensors are DMA'd once and stay VMEM-resident
    for the whole sequence; (h, c) is carried in VMEM scratch across steps.
    Returns per-step (output, context, neighbor_context, h, c).
    """
    T, B, I = x_seq.shape
    H = h0.shape[1]
    K = encoder_matrix.shape[1]
    nbr_flat = neighbor_matrix.reshape(
        B, neighbor_matrix.shape[1] * neighbor_matrix.shape[2], neighbor_matrix.shape[3])
    w_slab = packed_params["w_slab"]
    b_slab = packed_params["b_slab"]
    out_w = 5 * LANE
    f32 = jnp.float32

    packed_out = pl.pallas_call(
        decoder_rnn_kernel,
        out_shape=jax.ShapeDtypeStruct((T, B, out_w), f32),
        grid=(T,),
        in_specs=[
            pl.BlockSpec((1, B, I), lambda t: (t, 0, 0)),        # per-step input
            pl.BlockSpec((B, H), lambda t: (0, 0)),              # h0   (resident)
            pl.BlockSpec((B, H), lambda t: (0, 0)),              # c0   (resident)
            pl.BlockSpec((B, K, H), lambda t: (0, 0, 0)),        # encoder (resident)
            pl.BlockSpec((B, K * 8, H), lambda t: (0, 0, 0)),    # neighbors (resident)
            pl.BlockSpec(w_slab.shape, lambda t: (0, 0)),        # weight slab (resident)
            pl.BlockSpec(b_slab.shape, lambda t: (0, 0)),        # bias slab (resident)
        ],
        out_specs=pl.BlockSpec((1, B, out_w), lambda t: (t, 0, 0)),
        scratch_shapes=[pltpu.VMEM((B, H), f32), pltpu.VMEM((B, H), f32)],
        compiler_params=pltpu.CompilerParams(dimension_semantics=("arbitrary",)),
    )(x_seq.astype(f32), h0.astype(f32), c0.astype(f32),
      encoder_matrix.astype(f32), nbr_flat.astype(f32), w_slab, b_slab)

    output = packed_out[:, :, 0:I]
    context = packed_out[:, :, 1 * LANE:1 * LANE + H]
    neighbor_context = packed_out[:, :, 2 * LANE:2 * LANE + H]
    h_seq = packed_out[:, :, 3 * LANE:3 * LANE + H]
    c_seq = packed_out[:, :, 4 * LANE:4 * LANE + H]
    return output, context, neighbor_context, h_seq, c_seq


def decoder_rnn_forward(input_seq, last_context, last_hidden, encoder_matrix,
                        neighbor_matrix, packed_params):
    """Mirrors DecoderRNN.forward (last_context is unused by the torch code)."""
    del last_context
    h0, c0 = last_hidden
    out, ctx, nctx, h_seq, c_seq = decoder_rnn_sequence(
        input_seq[None], h0, c0, encoder_matrix, neighbor_matrix, packed_params)
    # torch returns (output, context, hidden); neighbor_context is also returned
    # because the torch code computes it (for the omitted .npy analysis dump).
    return out[0], ctx[0], (h_seq[0], c_seq[0]), nctx[0]


def init_params(key, input_size, hidden_size, K):
    """Deterministic parameter init matching the shapes in DecoderRNN.__init__."""
    H, I = hidden_size, input_size
    ks = jax.random.split(key, 12)
    s = 1.0 / jnp.sqrt(H)
    u = lambda k, shape: jax.random.uniform(k, shape, jnp.float32, -s, s)
    return {
        # LSTMCell(input_size, hidden_size): weight_ih (4H, I), weight_hh (4H, H)
        "w_ih": u(ks[0], (4 * H, I)),
        "w_hh": u(ks[1], (4 * H, H)),
        "b_ih": u(ks[2], (4 * H,)),
        "b_hh": u(ks[3], (4 * H,)),
        # select_attn: Linear(H, K, bias=False); neighbor_attn: Linear(H, K*8, bias=False)
        "w_sel": u(ks[4], (K, H)),
        "w_nb": u(ks[5], (K * 8, H)),
        # net: Linear(H,H) -> LeakyReLU -> Linear(H,H) -> LeakyReLU -> Linear(H,I)
        "w1": u(ks[6], (H, H)), "b1": u(ks[7], (H,)),
        "w2": u(ks[8], (H, H)), "b2": u(ks[9], (H,)),
        "w3": u(ks[10], (I, H)), "b3": u(ks[11], (I,)),
    }


def _reference_forward(x, last_hidden, enc, nbr, p):
    """Pure-JAX reference of the torch forward for a sanity check."""
    h0, c0 = last_hidden
    H = h0.shape[1]
    gates = x @ p["w_ih"].T + p["b_ih"] + h0 @ p["w_hh"].T + p["b_hh"]
    i = jax.nn.sigmoid(gates[:, :H])
    f = jax.nn.sigmoid(gates[:, H:2 * H])
    g = jnp.tanh(gates[:, 2 * H:3 * H])
    o = jax.nn.sigmoid(gates[:, 3 * H:])
    c1 = f * c0 + i * g
    h1 = o * jnp.tanh(c1)
    beta = jax.nn.softmax(h1 @ p["w_sel"].T, axis=1)[:, :, None]
    context = jnp.sum(beta * enc, axis=1)
    nbeta = jax.nn.softmax(h1 @ p["w_nb"].T, axis=1)[:, :, None]
    nbr_flat = nbr.reshape(nbr.shape[0], nbr.shape[1] * nbr.shape[2], nbr.shape[3])
    nctx = jnp.sum(nbeta * nbr_flat, axis=1)
    y = h1 @ p["w1"].T + p["b1"]
    y = jnp.where(y > 0, y, 0.01 * y)
    y = y @ p["w2"].T + p["b2"]
    y = jnp.where(y > 0, y, 0.01 * y)
    out = y @ p["w3"].T + p["b3"]
    return out, context, (h1, c1), nctx


if __name__ == "__main__":
    B = 8
    input_size = 16
    hidden_size = 32
    output_size = 10   # embedding table size; unused in forward
    K = 4
    neighbor_num = 8   # forward hardcodes K*8 regardless
    T = 6              # decode steps for the sequence-level call

    key = jax.random.PRNGKey(0)
    k_x, k_h, k_c, k_enc, k_nbr, k_ctx, k_par = jax.random.split(key, 7)

    x_seq = jax.random.normal(k_x, (T, B, input_size), jnp.float32)
    last_context = jax.random.normal(k_ctx, (B, hidden_size), jnp.float32)  # unused, like torch
    h0 = jax.random.normal(k_h, (B, hidden_size), jnp.float32)
    c0 = jax.random.normal(k_c, (B, hidden_size), jnp.float32)
    encoder_matrix = jax.random.normal(k_enc, (B, K, hidden_size), jnp.float32)
    neighbor_matrix = jax.random.normal(k_nbr, (B, K, neighbor_num, hidden_size), jnp.float32)

    params = init_params(k_par, input_size, hidden_size, K)
    packed_params = pack_params(params, input_size, hidden_size, K)

    # --- single step (matches DecoderRNN.forward exactly) -------------------
    output, context, hidden, neighbor_context = decoder_rnn_forward(
        x_seq[0], last_context, (h0, c0), encoder_matrix, neighbor_matrix, packed_params)
    jax.block_until_ready((output, context, hidden, neighbor_context))

    r_out, r_ctx, (r_h, r_c), r_nctx = _reference_forward(
        x_seq[0], (h0, c0), encoder_matrix, neighbor_matrix, params)
    for a, b in [(output, r_out), (context, r_ctx), (hidden[0], r_h),
                 (hidden[1], r_c), (neighbor_context, r_nctx)]:
        assert jnp.allclose(a, b, rtol=1e-2, atol=1e-2), "single-step mismatch vs reference"

    # --- full decode sequence inside one pallas_call ------------------------
    outs, ctxs, nctxs, hs, cs = decoder_rnn_sequence(
        x_seq, h0, c0, encoder_matrix, neighbor_matrix, packed_params)
    jax.block_until_ready((outs, ctxs, nctxs, hs, cs))

    rh, rc = h0, c0
    for t in range(T):
        r_out, r_ctx, (rh, rc), r_nctx = _reference_forward(
            x_seq[t], (rh, rc), encoder_matrix, neighbor_matrix, params)
        for a, b in [(outs[t], r_out), (ctxs[t], r_ctx), (nctxs[t], r_nctx),
                     (hs[t], rh), (cs[t], rc)]:
            assert jnp.allclose(a, b, rtol=1e-2, atol=1e-2), f"sequence mismatch at step {t}"

    print("KERNEL_OK")
</pallas_src>

<mosaic_0001>
module attributes {stable_mosaic.version = 11 : i64} {
  func.func @decoder_rnn_kernel(%arg0: i32, %arg1: memref<1x8x16xf32, #tpu.memory_space<vmem>>, %arg2: memref<8x32xf32, #tpu.memory_space<vmem>>, %arg3: memref<8x32xf32, #tpu.memory_space<vmem>>, %arg4: memref<8x4x32xf32, #tpu.memory_space<vmem>>, %arg5: memref<8x32x32xf32, #tpu.memory_space<vmem>>, %arg6: memref<336x128xf32, #tpu.memory_space<vmem>>, %arg7: memref<4x128xf32, #tpu.memory_space<vmem>>, %arg8: memref<1x8x640xf32, #tpu.memory_space<vmem>>, %arg9: memref<8x32xf32, #tpu.memory_space<vmem>>, %arg10: memref<8x32xf32, #tpu.memory_space<vmem>>) attributes {dimension_semantics = [#tpu.dimension_semantics<arbitrary>], iteration_bounds = array<i64: 1>, scalar_prefetch = 0 : i64, scratch_operands = 2 : i64, tpu.core_type = #tpu.core_type<tc>, window_params = [{transform_indices = @transform_0, window_bounds = array<i64: 1, 8, 16>}, {pipeline_mode = #tpu.pipeline_mode<synchronous>, transform_indices = @transform_1, window_bounds = array<i64: 8, 32>}, {pipeline_mode = #tpu.pipeline_mode<synchronous>, transform_indices = @transform_2, window_bounds = array<i64: 8, 32>}, {pipeline_mode = #tpu.pipeline_mode<synchronous>, transform_indices = @transform_3, window_bounds = array<i64: 8, 4, 32>}, {pipeline_mode = #tpu.pipeline_mode<synchronous>, transform_indices = @transform_4, window_bounds = array<i64: 8, 32, 32>}, {pipeline_mode = #tpu.pipeline_mode<synchronous>, transform_indices = @transform_5, window_bounds = array<i64: 336, 128>}, {pipeline_mode = #tpu.pipeline_mode<synchronous>, transform_indices = @transform_6, window_bounds = array<i64: 4, 128>}, {transform_indices = @transform_7, window_bounds = array<i64: 1, 8, 640>}]} {
    %c0_i32 = arith.constant 0 : i32
    %0 = arith.cmpi eq, %arg0, %c0_i32 : i32
    %1 = arith.extui %0 : i1 to i32
    %c0_i32_0 = arith.constant 0 : i32
    %2 = arith.cmpi ne, %1, %c0_i32_0 : i32
    scf.if %2 {
      %c0_60 = arith.constant 0 : index
      %c0_61 = arith.constant 0 : index
      %118 = vector.load %arg2[%c0_60, %c0_61] : memref<8x32xf32, #tpu.memory_space<vmem>>, vector<8x32xf32>
      %c0_62 = arith.constant 0 : index
      %c0_63 = arith.constant 0 : index
      %119 = vector.load %arg9[%c0_62, %c0_63] : memref<8x32xf32, #tpu.memory_space<vmem>>, vector<8x32xf32>
      tpu.vector_store %arg9[%c0_62, %c0_63], %118 {strides = array<i32>} : memref<8x32xf32, #tpu.memory_space<vmem>>, vector<8x32xf32>,
      %c0_64 = arith.constant 0 : index
      %c0_65 = arith.constant 0 : index
      %120 = vector.load %arg3[%c0_64, %c0_65] : memref<8x32xf32, #tpu.memory_space<vmem>>, vector<8x32xf32>
      %c0_66 = arith.constant 0 : index
      %c0_67 = arith.constant 0 : index
      %121 = vector.load %arg10[%c0_66, %c0_67] : memref<8x32xf32, #tpu.memory_space<vmem>>, vector<8x32xf32>
      tpu.vector_store %arg10[%c0_66, %c0_67], %120 {strides = array<i32>} : memref<8x32xf32, #tpu.memory_space<vmem>>, vector<8x32xf32>,
    } else {
    }
    %c0 = arith.constant 0 : index
    %c0_1 = arith.constant 0 : index
    %c0_2 = arith.constant 0 : index
    %3 = vector.load %arg1[%c0, %c0_1, %c0_2] : memref<1x8x16xf32, #tpu.memory_space<vmem>>, vector<1x8x16xf32>
    %4 = vector.shape_cast %3 : vector<1x8x16xf32> to vector<8x16xf32>
    %c0_3 = arith.constant 0 : index
    %c0_4 = arith.constant 0 : index
    %5 = vector.load %arg9[%c0_3, %c0_4] : memref<8x32xf32, #tpu.memory_space<vmem>>, vector<8x32xf32>
    %c0_5 = arith.constant 0 : index
    %c0_6 = arith.constant 0 : index
    %6 = vector.load %arg10[%c0_5, %c0_6] : memref<8x32xf32, #tpu.memory_space<vmem>>, vector<8x32xf32>
    %c0_7 = arith.constant 0 : index
    %c0_8 = arith.constant 0 : index
    %7 = vector.load %arg6[%c0_7, %c0_8] : memref<336x128xf32, #tpu.memory_space<vmem>>, vector<16x128xf32>
    %cst = arith.constant dense<0.000000e+00> : vector<8x128xf32>
    %8 = tpu.matmul %4, %7, %cst {dimension_numbers = #tpu.dot_dimension_numbers<[1], [0], [0], [1], [0, 0, 1, 1], [], []>} : vector<8x16xf32>, vector<16x128xf32>, vector<8x128xf32> -> vector<8x128xf32>
    %c16 = arith.constant 16 : index
    %c0_9 = arith.constant 0 : index
    %9 = vector.load %arg6[%c16, %c0_9] : memref<336x128xf32, #tpu.memory_space<vmem>>, vector<32x128xf32>
    %cst_10 = arith.constant dense<0.000000e+00> : vector<8x128xf32>
    %10 = tpu.matmul %5, %9, %cst_10 {dimension_numbers = #tpu.dot_dimension_numbers<[1], [0], [0], [1], [0, 0, 1, 1], [], []>} : vector<8x32xf32>, vector<32x128xf32>, vector<8x128xf32> -> vector<8x128xf32>
    %11 = arith.addf %8, %10 : vector<8x128xf32>
    %c0_11 = arith.constant 0 : index
    %c0_12 = arith.constant 0 : index
    %12 = vector.load %arg7[%c0_11, %c0_12] : memref<4x128xf32, #tpu.memory_space<vmem>>, vector<1x128xf32>
    %13 = vector.broadcast %12 : vector<1x128xf32> to vector<8x128xf32>
    %14 = arith.addf %11, %13 : vector<8x128xf32>
    %15 = vector.extract_strided_slice %14 {offsets = [0, 0], sizes = [8, 32], strides = [1, 1]} : vector<8x128xf32> to vector<8x32xf32>
    %16 = arith.negf %15 : vector<8x32xf32>
    %17 = math.exp %16 : vector<8x32xf32>
    %cst_13 = arith.constant 1.000000e+00 : f32
    %18 = vector.broadcast %cst_13 : f32 to vector<8x32xf32>
    %19 = arith.addf %18, %17 : vector<8x32xf32>
    %20 = arith.divf %18, %19 : vector<8x32xf32>
    %21 = vector.extract_strided_slice %14 {offsets = [0, 32], sizes = [8, 32], strides = [1, 1]} : vector<8x128xf32> to vector<8x32xf32>
    %22 = arith.negf %21 : vector<8x32xf32>
    %23 = math.exp %22 : vector<8x32xf32>
    %cst_14 = arith.constant 1.000000e+00 : f32
    %24 = vector.broadcast %cst_14 : f32 to vector<8x32xf32>
    %25 = arith.addf %24, %23 : vector<8x32xf32>
    %26 = arith.divf %24, %25 : vector<8x32xf32>
    %27 = vector.extract_strided_slice %14 {offsets = [0, 64], sizes = [8, 32], strides = [1, 1]} : vector<8x128xf32> to vector<8x32xf32>
    %28 = math.tanh %27 : vector<8x32xf32>
    %29 = vector.extract_strided_slice %14 {offsets = [0, 96], sizes = [8, 32], strides = [1, 1]} : vector<8x128xf32> to vector<8x32xf32>
    %30 = arith.negf %29 : vector<8x32xf32>
    %31 = math.exp %30 : vector<8x32xf32>
    %cst_15 = arith.constant 1.000000e+00 : f32
    %32 = vector.broadcast %cst_15 : f32 to vector<8x32xf32>
    %33 = arith.addf %32, %31 : vector<8x32xf32>
    %34 = arith.divf %32, %33 : vector<8x32xf32>
    %35 = arith.mulf %26, %6 : vector<8x32xf32>
    %36 = arith.mulf %20, %28 : vector<8x32xf32>
    %37 = arith.addf %35, %36 : vector<8x32xf32>
    %38 = math.tanh %37 : vector<8x32xf32>
    %39 = arith.mulf %34, %38 : vector<8x32xf32>
    %c0_16 = arith.constant 0 : index
    %c0_17 = arith.constant 0 : index
    %40 = vector.load %arg9[%c0_16, %c0_17] : memref<8x32xf32, #tpu.memory_space<vmem>>, vector<8x32xf32>
    tpu.vector_store %arg9[%c0_16, %c0_17], %39 {strides = array<i32>} : memref<8x32xf32, #tpu.memory_space<vmem>>, vector<8x32xf32>,
    %c0_18 = arith.constant 0 : index
    %c0_19 = arith.constant 0 : index
    %41 = vector.load %arg10[%c0_18, %c0_19] : memref<8x32xf32, #tpu.memory_space<vmem>>, vector<8x32xf32>
    tpu.vector_store %arg10[%c0_18, %c0_19], %37 {strides = array<i32>} : memref<8x32xf32, #tpu.memory_space<vmem>>, vector<8x32xf32>,
    %c48 = arith.constant 48 : index
    %c0_20 = arith.constant 0 : index
    %42 = vector.load %arg6[%c48, %c0_20] : memref<336x128xf32, #tpu.memory_space<vmem>>, vector<32x128xf32>
    %cst_21 = arith.constant dense<0.000000e+00> : vector<8x128xf32>
    %43 = tpu.matmul %39, %42, %cst_21 {dimension_numbers = #tpu.dot_dimension_numbers<[1], [0], [0], [1], [0, 0, 1, 1], [], []>} : vector<8x32xf32>, vector<32x128xf32>, vector<8x128xf32> -> vector<8x128xf32>
    %c1 = arith.constant 1 : index
    %c0_22 = arith.constant 0 : index
    %44 = vector.load %arg7[%c1, %c0_22] : memref<4x128xf32, #tpu.memory_space<vmem>>, vector<1x128xf32>
    %45 = vector.broadcast %44 : vector<1x128xf32> to vector<8x128xf32>
    %46 = arith.addf %43, %45 : vector<8x128xf32>
    %47 = vector.extract_strided_slice %46 {offsets = [0, 0], sizes = [8, 4], strides = [1, 1]} : vector<8x128xf32> to vector<8x4xf32>
    %cst_23 = arith.constant dense<0xFF800000> : vector<8xf32>
    %48 = vector.multi_reduction <maximumf>, %47, %cst_23 [1] : vector<8x4xf32> to vector<8xf32>
    %49 = vector.shape_cast %48 : vector<8xf32> to vector<8x1xf32>
    %50 = vector.broadcast %49 : vector<8x1xf32> to vector<8x4xf32>
    %51 = arith.subf %47, %50 : vector<8x4xf32>
    %52 = math.exp %51 : vector<8x4xf32>
    %cst_24 = arith.constant dense<0.000000e+00> : vector<8xf32>
    %53 = vector.multi_reduction <add>, %52, %cst_24 [1] : vector<8x4xf32> to vector<8xf32>
    %54 = vector.shape_cast %53 : vector<8xf32> to vector<8x1xf32>
    %55 = tpu.reciprocal %54 {approx = true} : vector<8x1xf32> -> vector<8x1xf32>
    %56 = vector.broadcast %55 : vector<8x1xf32> to vector<8x4xf32>
    %57 = arith.mulf %52, %56 : vector<8x4xf32>
    %58 = vector.shape_cast %57 : vector<8x4xf32> to vector<8x4x1xf32>
    %c0_25 = arith.constant 0 : index
    %c0_26 = arith.constant 0 : index
    %c0_27 = arith.constant 0 : index
    %59 = vector.load %arg4[%c0_25, %c0_26, %c0_27] : memref<8x4x32xf32, #tpu.memory_space<vmem>>, vector<8x4x32xf32>
    %60 = vector.broadcast %58 : vector<8x4x1xf32> to vector<8x4x32xf32>
    %61 = arith.mulf %60, %59 : vector<8x4x32xf32>
    %cst_28 = arith.constant dense<0.000000e+00> : vector<8x32xf32>
    %62 = vector.multi_reduction <add>, %61, %cst_28 [1] : vector<8x4x32xf32> to vector<8x32xf32>
    %63 = vector.extract_strided_slice %46 {offsets = [0, 4], sizes = [8, 32], strides = [1, 1]} : vector<8x128xf32> to vector<8x32xf32>
    %cst_29 = arith.constant dense<0xFF800000> : vector<8xf32>
    %64 = vector.multi_reduction <maximumf>, %63, %cst_29 [1] : vector<8x32xf32> to vector<8xf32>
    %65 = vector.shape_cast %64 : vector<8xf32> to vector<8x1xf32>
    %66 = vector.broadcast %65 : vector<8x1xf32> to vector<8x32xf32>
    %67 = arith.subf %63, %66 : vector<8x32xf32>
    %68 = math.exp %67 : vector<8x32xf32>
    %cst_30 = arith.constant dense<0.000000e+00> : vector<8xf32>
    %69 = vector.multi_reduction <add>, %68, %cst_30 [1] : vector<8x32xf32> to vector<8xf32>
    %70 = vector.shape_cast %69 : vector<8xf32> to vector<8x1xf32>
    %71 = tpu.reciprocal %70 {approx = true} : vector<8x1xf32> -> vector<8x1xf32>
    %72 = vector.broadcast %71 : vector<8x1xf32> to vector<8x32xf32>
    %73 = arith.mulf %68, %72 : vector<8x32xf32>
    %74 = vector.shape_cast %73 : vector<8x32xf32> to vector<8x32x1xf32>
    %c0_31 = arith.constant 0 : index
    %c0_32 = arith.constant 0 : index
    %c0_33 = arith.constant 0 : index
    %75 = vector.load %arg5[%c0_31, %c0_32, %c0_33] : memref<8x32x32xf32, #tpu.memory_space<vmem>>, vector<8x32x32xf32>
    %76 = vector.broadcast %74 : vector<8x32x1xf32> to vector<8x32x32xf32>
    %77 = arith.mulf %76, %75 : vector<8x32x32xf32>
    %cst_34 = arith.constant dense<0.000000e+00> : vector<8x32xf32>
    %78 = vector.multi_reduction <add>, %77, %cst_34 [1] : vector<8x32x32xf32> to vector<8x32xf32>
    %cst_35 = arith.constant 0.000000e+00 : f32
    %79 = vector.broadcast %cst_35 : f32 to vector<8x128xf32>
    %80 = arith.cmpf ogt, %46, %79 : vector<8x128xf32>
    %cst_36 = arith.constant 0.00999999977 : f32
    %81 = vector.broadcast %cst_36 : f32 to vector<8x128xf32>
    %82 = arith.mulf %81, %46 : vector<8x128xf32>
    %83 = arith.select %80, %46, %82 : vector<8x128xi1>, vector<8x128xf32>
    %c80 = arith.constant 80 : index
    %c0_37 = arith.constant 0 : index
    %84 = vector.load %arg6[%c80, %c0_37] : memref<336x128xf32, #tpu.memory_space<vmem>>, vector<128x128xf32>
    %cst_38 = arith.constant dense<0.000000e+00> : vector<8x128xf32>
    %85 = tpu.matmul %83, %84, %cst_38 {dimension_numbers = #tpu.dot_dimension_numbers<[1], [0], [0], [1], [0, 0, 1, 1], [], []>} : vector<8x128xf32>, vector<128x128xf32>, vector<8x128xf32> -> vector<8x128xf32>
    %c2 = arith.constant 2 : index
    %c0_39 = arith.constant 0 : index
    %86 = vector.load %arg7[%c2, %c0_39] : memref<4x128xf32, #tpu.memory_space<vmem>>, vector<1x128xf32>
    %87 = vector.broadcast %86 : vector<1x128xf32> to vector<8x128xf32>
    %88 = arith.addf %85, %87 : vector<8x128xf32>
    %cst_40 = arith.constant 0.000000e+00 : f32
    %89 = vector.broadcast %cst_40 : f32 to vector<8x128xf32>
    %90 = arith.cmpf ogt, %88, %89 : vector<8x128xf32>
    %cst_41 = arith.constant 0.00999999977 : f32
    %91 = vector.broadcast %cst_41 : f32 to vector<8x128xf32>
    %92 = arith.mulf %91, %88 : vector<8x128xf32>
    %93 = arith.select %90, %88, %92 : vector<8x128xi1>, vector<8x128xf32>
    %c208 = arith.constant 208 : index
    %c0_42 = arith.constant 0 : index
    %94 = vector.load %arg6[%c208, %c0_42] : memref<336x128xf32, #tpu.memory_space<vmem>>, vector<128x128xf32>
    %cst_43 = arith.constant dense<0.000000e+00> : vector<8x128xf32>
    %95 = tpu.matmul %93, %94, %cst_43 {dimension_numbers = #tpu.dot_dimension_numbers<[1], [0], [0], [1], [0, 0, 1, 1], [], []>} : vector<8x128xf32>, vector<128x128xf32>, vector<8x128xf32> -> vector<8x128xf32>
    %c3 = arith.constant 3 : index
    %c0_44 = arith.constant 0 : index
    %96 = vector.load %arg7[%c3, %c0_44] : memref<4x128xf32, #tpu.memory_space<vmem>>, vector<1x128xf32>
    %97 = vector.broadcast %96 : vector<1x128xf32> to vector<8x128xf32>
    %98 = arith.addf %95, %97 : vector<8x128xf32>
    %cst_45 = arith.constant 0.000000e+00 : f32
    %99 = vector.broadcast %cst_45 : f32 to vector<8x640xf32>
    %c0_46 = arith.constant 0 : index
    %c0_47 = arith.constant 0 : index
    %c0_48 = arith.constant 0 : index
    %100 = vector.load %arg8[%c0_46, %c0_47, %c0_48] : memref<1x8x640xf32, #tpu.memory_space<vmem>>, vector<1x8x640xf32>
    %101 = vector.shape_cast %100 : vector<1x8x640xf32> to vector<8x640xf32>
    %102 = vector.shape_cast %99 : vector<8x640xf32> to vector<1x8x640xf32>
    tpu.vector_store %arg8[%c0_46, %c0_47, %c0_48], %102 {strides = array<i32>} : memref<1x8x640xf32, #tpu.memory_space<vmem>>, vector<1x8x640xf32>,
    %c0_49 = arith.constant 0 : index
    %c0_50 = arith.constant 0 : index
    %c0_51 = arith.constant 0 : index
    %103 = vector.load %arg8[%c0_49, %c0_50, %c0_51] : memref<1x8x640xf32, #tpu.memory_space<vmem>>, vector<1x8x128xf32>
    %104 = vector.shape_cast %103 : vector<1x8x128xf32> to vector<8x128xf32>
    %105 = vector.shape_cast %98 : vector<8x128xf32> to vector<1x8x128xf32>
    tpu.vector_store %arg8[%c0_49, %c0_50, %c0_51], %105 {strides = array<i32>} : memref<1x8x640xf32, #tpu.memory_space<vmem>>, vector<1x8x128xf32>,
    %c0_52 = arith.constant 0 : index
    %c0_53 = arith.constant 0 : index
    %c128 = arith.constant 128 : index
    %106 = vector.load %arg8[%c0_52, %c0_53, %c128] : memref<1x8x640xf32, #tpu.memory_space<vmem>>, vector<1x8x32xf32>
    %107 = vector.shape_cast %106 : vector<1x8x32xf32> to vector<8x32xf32>
    %108 = vector.shape_cast %62 : vector<8x32xf32> to vector<1x8x32xf32>
    tpu.vector_store %arg8[%c0_52, %c0_53, %c128], %108 {strides = array<i32>} : memref<1x8x640xf32, #tpu.memory_space<vmem>>, vector<1x8x32xf32>,
    %c0_54 = arith.constant 0 : index
    %c0_55 = arith.constant 0 : index
    %c256 = arith.constant 256 : index
    %109 = vector.load %arg8[%c0_54, %c0_55, %c256] : memref<1x8x640xf32, #tpu.memory_space<vmem>>, vector<1x8x32xf32>
    %110 = vector.shape_cast %109 : vector<1x8x32xf32> to vector<8x32xf32>
    %111 = vector.shape_cast %78 : vector<8x32xf32> to vector<1x8x32xf32>
    tpu.vector_store %arg8[%c0_54, %c0_55, %c256], %111 {strides = array<i32>} : memref<1x8x640xf32, #tpu.memory_space<vmem>>, vector<1x8x32xf32>,
    %c0_56 = arith.constant 0 : index
    %c0_57 = arith.constant 0 : index
    %c384 = arith.constant 384 : index
    %112 = vector.load %arg8[%c0_56, %c0_57, %c384] : memref<1x8x640xf32, #tpu.memory_space<vmem>>, vector<1x8x32xf32>
    %113 = vector.shape_cast %112 : vector<1x8x32xf32> to vector<8x32xf32>
    %114 = vector.shape_cast %39 : vector<8x32xf32> to vector<1x8x32xf32>
    tpu.vector_store %arg8[%c0_56, %c0_57, %c384], %114 {strides = array<i32>} : memref<1x8x640xf32, #tpu.memory_space<vmem>>, vector<1x8x32xf32>,
    %c0_58 = arith.constant 0 : index
    %c0_59 = arith.constant 0 : index
    %c512 = arith.constant 512 : index
    %115 = vector.load %arg8[%c0_58, %c0_59, %c512] : memref<1x8x640xf32, #tpu.memory_space<vmem>>, vector<1x8x32xf32>
    %116 = vector.shape_cast %115 : vector<1x8x32xf32> to vector<8x32xf32>
    %117 = vector.shape_cast %37 : vector<8x32xf32> to vector<1x8x32xf32>
    tpu.vector_store %arg8[%c0_58, %c0_59, %c512], %117 {strides = array<i32>} : memref<1x8x640xf32, #tpu.memory_space<vmem>>, vector<1x8x32xf32>,
    return
  }
  func.func @transform_0(%arg0: i32) -> (i32, i32, i32) {
    %c0_i32 = arith.constant 0 : i32
    %c0_i32_0 = arith.constant 0 : i32
    %c0_i32_1 = arith.constant 0 : i32
    return %arg0, %c0_i32, %c0_i32_0 : i32, i32, i32
  }
  func.func @transform_1(%arg0: i32) -> (i32, i32) {
    %c0_i32 = arith.constant 0 : i32
    %c0_i32_0 = arith.constant 0 : i32
    %c0_i32_1 = arith.constant 0 : i32
    return %c0_i32, %c0_i32_0 : i32, i32
  }
  func.func @transform_2(%arg0: i32) -> (i32, i32) {
    %c0_i32 = arith.constant 0 : i32
    %c0_i32_0 = arith.constant 0 : i32
    %c0_i32_1 = arith.constant 0 : i32
    return %c0_i32, %c0_i32_0 : i32, i32
  }
  func.func @transform_3(%arg0: i32) -> (i32, i32, i32) {
    %c0_i32 = arith.constant 0 : i32
    %c0_i32_0 = arith.constant 0 : i32
    %c0_i32_1 = arith.constant 0 : i32
    %c0_i32_2 = arith.constant 0 : i32
    return %c0_i32, %c0_i32_0, %c0_i32_1 : i32, i32, i32
  }
  func.func @transform_4(%arg0: i32) -> (i32, i32, i32) {
    %c0_i32 = arith.constant 0 : i32
    %c0_i32_0 = arith.constant 0 : i32
    %c0_i32_1 = arith.constant 0 : i32
    %c0_i32_2 = arith.constant 0 : i32
    return %c0_i32, %c0_i32_0, %c0_i32_1 : i32, i32, i32
  }
  func.func @transform_5(%arg0: i32) -> (i32, i32) {
    %c0_i32 = arith.constant 0 : i32
    %c0_i32_0 = arith.constant 0 : i32
    %c0_i32_1 = arith.constant 0 : i32
    return %c0_i32, %c0_i32_0 : i32, i32
  }
  func.func @transform_6(%arg0: i32) -> (i32, i32) {
    %c0_i32 = arith.constant 0 : i32
    %c0_i32_0 = arith.constant 0 : i32
    %c0_i32_1 = arith.constant 0 : i32
    return %c0_i32, %c0_i32_0 : i32, i32
  }
  func.func @transform_7(%arg0: i32) -> (i32, i32, i32) {
    %c0_i32 = arith.constant 0 : i32
    %c0_i32_0 = arith.constant 0 : i32
    %c0_i32_1 = arith.constant 0 : i32
    return %arg0, %c0_i32, %c0_i32_0 : i32, i32, i32
  }
}

</mosaic_0001>

<bundles_post_ra>
// kernel: decoder_rnn_sequence.1
= control target key start
LH: loop header
LB: loop body
LE: loop exit
PB: predicated region body
PF: predicated region fallthrough
CT: control target
= control target key end

     0   :  { %12 = vsyncpa [#allocation5], 0  ;;  %s1445_s0 = inlined_call_operand.hbm [shape: f32[1,8,16], index: 0, kind: input, shape index: {}]   ;;  %s1446_s1 = inlined_call_operand.hbm [shape: f32[8,32], index: 1, kind: input, shape index: {}]   ;;  %s1447_s2 = inlined_call_operand.hbm [shape: f32[8,32], index: 2, kind: input, shape index: {}]   ;;  %s1448_s3 = inlined_call_operand.hbm [shape: f32[8,4,32], index: 3, kind: input, shape index: {}]   ;;  %s1449_s4 = inlined_call_operand.hbm [shape: f32[8,32,32], index: 4, kind: input, shape index: {}]   ;;  %s1450_s5 = inlined_call_operand.hbm [shape: f32[336,128], index: 5, kind: input, shape index: {}]   ;;  %s1451_s6 = inlined_call_operand.hbm [shape: f32[4,128], index: 6, kind: input, shape index: {}]   ;;  %s1452_s7 = inlined_call_operand.vmem [shape: f32[1,8,640], index: 7, kind: output, shape index: {}]  }
   0x1   :  { %13 = vsyncpa [#allocation7], 0 }
   0x2   :  { %14 = vsyncpa [#allocation10], 0  ;;  %s32_s26 = sshll.u32 %s1446_s1, 4  ;;  %s33_s26 = int_to_ptr.hbm [resolvable:$true] %s32_s26 }
   0x3   :  { %15 = vsyncpa [#allocation13], 0  ;;  %s1184_s27 = smov [#allocation6]   ;;  %s53_s8 = sshll.u32 %s1448_s3, 4  ;;  %s54_s8 = int_to_ptr.hbm [resolvable:$true] %s53_s8 }
   0x4   :  { %s34_s28 = sshll.u32 %s1184_s27, 4  ;;  %s1185_s9 = smov [#allocation9]   ;;  %s35_s28 = int_to_ptr.vmem [resolvable:$true] %s34_s28 }
   0x5   :  { %37 = dma.hbm_to_vmem [thread:$0]  %s33_s26, 128, %s35_s28, [#allocation7]  }
   0x6   :  { %s55_s10 = sshll.u32 %s1185_s9, 4  ;;  %s1186_s11 = smov 64   ;;  %s56_s10 = int_to_ptr.vmem [resolvable:$true] %s55_s10 }
   0x7   :  { %s1187_s12 = smov 4   ;;  %s79_s14 = sshll.u32 %s1450_s5, 4  ;;  %s80_s14 = int_to_ptr.hbm [resolvable:$true] %s79_s14 }
   0x8   :  { %61 = dma.hbm_to_vmem [thread:$0]  %s54_s8, 512, %s56_s10, [#allocation10], %s1186_s11, %s1186_s11, %s1187_s12  }
   0x9   :  { %s1188_s15 = smov [#allocation12]   ;;  %s21_s18 = sshll.u32 %s1445_s0, 4  ;;  %s22_s18 = int_to_ptr.hbm [resolvable:$true] %s21_s18 }
   0xa   :  { %s81_s16 = sshll.u32 %s1188_s15, 4  ;;  %s1189_s19 = smov 128   ;;  %s82_s16 = int_to_ptr.vmem [resolvable:$true] %s81_s16 }
   0xb   :  { %s1190_s20 = smov 8   ;;  %s1191_s21 = smov [#allocation4]  }
   0xc   :  { %87 = dma.hbm_to_vmem [thread:$0]  %s80_s14, 5376, %s82_s16, [#allocation13], %s1189_s19, %s1189_s19, %s1190_s20  }
   0xd   :  { %s23_s22 = sshll.u32 %s1191_s21, 4  ;;  %s43_s25 = sshll.u32 %s1447_s2, 4  ;;  %s24_s22 = int_to_ptr.vmem [resolvable:$true] %s23_s22  ;;  %s44_s25 = int_to_ptr.hbm [resolvable:$true] %s43_s25 }
   0xe   :  { %26 = dma.hbm_to_vmem [thread:$0]  %s22_s18, 128, %s24_s22, [#allocation5]  }
   0xf   :  { %s66_s27 = sshll.u32 %s1449_s4, 4  ;;  %s1192_s28 = smov [#allocation8]   ;;  %s67_s27 = int_to_ptr.hbm [resolvable:$true] %s66_s27 }
  0x10   :  { %s45_s29 = sshll.u32 %s1192_s28, 4  ;;  %s1193_s0 = smov [#allocation11]   ;;  %s46_s29 = int_to_ptr.vmem [resolvable:$true] %s45_s29 }
  0x11   :  { %48 = dma.hbm_to_vmem [thread:$0]  %s44_s25, 128, %s46_s29, [#allocation7]  }
  0x12   :  { %s68_s30 = sshll.u32 %s1193_s0, 4  ;;  %s93_s10 = sshll.u32 %s1451_s6, 4  ;;  %s69_s30 = int_to_ptr.vmem [resolvable:$true] %s68_s30  ;;  %s94_s10 = int_to_ptr.hbm [resolvable:$true] %s93_s10 }
  0x13   :  { %74 = dma.hbm_to_vmem [thread:$0]  %s67_s27, 4096, %s69_s30, [#allocation10], %s1189_s19, %s1189_s19, %s1190_s20  }
  0x14   :  { %s1194_s2 = smov [#allocation14]  }
  0x15   :  { %s95_s12 = sshll.u32 %s1194_s2, 4  ;;  %s96_s12 = int_to_ptr.vmem [resolvable:$true] %s95_s12 }
  0x16   :  { %98 = dma.hbm_to_vmem [thread:$0]  %s94_s10, 64, %s96_s12, [#allocation13]  }
  0x17   :  { %1176 = dma.done.wait [#allocation5], 128  }
  0x18   :  { %1177 = vsyncadd [#allocation5], 4294967168 }
  0x19   :  { %1178 = dma.done.wait [#allocation7], 256  }
  0x1a   :  { %1179 = vsyncadd [#allocation7], 4294967040 }
  0x1b   :  { %1180 = dma.done.wait [#allocation10], 4608  }
  0x1c   :  { %1181 = vsyncadd [#allocation10], 4294962688 }
  0x1d   :  { %1182 = dma.done.wait [#allocation13], 5440  }
  0x1e   :  { %1183 = vsyncadd [#allocation13], 4294961856  ;;  %vm132_vm0 = vcmask 261120   ;;  %v144_v0 = vld [vmem:[#allocation12 + $0x28] sm:$0xff]  ;;  %v143_v1 = vld [vmem:[#allocation12 + $0x20] sm:$0xff]  ;;  %vm169_vm1 = vcmask 130048  }
  0x1f   :  { %161 = vmatpush.msra.mxu0 %v144_v0  ;;  %v131_v2 = vld [vmem:[#allocation6] sm:$0xff]  ;;  %v142_v3 = vld [vmem:[#allocation12 + $0x18] sm:$0xff]  ;;  %v140_v5 = vld [vmem:[#allocation12 + $0x8] sm:$0xff]  ;;  %s1195_s4 = smov 32   ;;  %v1196_v39 = vmov 0.0   ;;  %s1197_s3 = smov 96  }
  0x20   :  { %133 = vst.msk [vmem:[#allocation2] sm:$0xff] %vm132_vm0, %v131_v2  ;;  %v141_v4 = vld [vmem:[#allocation12 + $0x10] sm:$0xff]  ;;  %v139_v6 = vld [vmem:[#allocation12] sm:$0xff]  ;;  %v136_v8 = vld [vmem:[#allocation4] sm:$0xff]  ;;  %vm416_vm6 = vcmask 293920   ;;  %vm275_vm7 = vcmask 31744  }
  0x21   :  { %162 = vmatpush.msra.mxu0 %v143_v1  ;;  %v134_v9 = vld [vmem:[#allocation8] sm:$0xff]  ;;  %v988_v11 = vld [vmem:[#allocation14] ss:$0 sm:$0xff]  ;;  %v250_v37 = vld [vmem:[#allocation12 + $0x48] sm:$0xff]  ;;  %883 = vst [vmem:[%s1452_s7 + $0x8] sm:$0xff] %v1196_v39  ;;  %s1198_s22 = smov 124  }
  0x22   :  { %135 = vst.msk [vmem:[#allocation3] sm:$0xff] %vm132_vm0, %v134_v9  ;;  %v249_v38 = vld [vmem:[#allocation12 + $0x40] sm:$0xff]  ;;  %267 = vmatpush.msra.mxu2 %v250_v37  ;;  %v248_v40 = vld [vmem:[#allocation12 + $0x38] sm:$0xff]  ;;  %v247_v41 = vld [vmem:[#allocation12 + $0x30] sm:$0xff]  ;;  %v288_v37 = vlaneseq  ;;  %vm359_vm10 = vcmask 257024   ;;  %vm896_vm11 = vcmask 1041409  }
  0x23   :  { %163 = vmatpush.msra.mxu0 %v142_v3  ;;  %884 = vst [vmem:[%s1452_s7 + $0x10] sm:$0xff] %v1196_v39  ;;  %v818_v44 = vld [vmem:[#allocation12 + $0xc8] sm:$0xff]  ;;  %v817_v45 = vld [vmem:[#allocation12 + $0xc0] sm:$0xff]  ;;  %v816_v46 = vld [vmem:[#allocation12 + $0xb8] sm:$0xff]  ;;  %vm898_vm12 = vcmask 1042434   ;;  %vm900_vm13 = vcmask 1043459  }
  0x24   :  { %268 = vmatpush.msra.mxu2 %v249_v38  ;;  %885 = vst [vmem:[%s1452_s7 + $0x18] sm:$0xff] %v1196_v39  ;;  %821 = vmatpush.msra.mxu3 %v818_v44  ;;  %v815_v47 = vld [vmem:[#allocation12 + $0xb0] sm:$0xff]  ;;  %v814_v48 = vld [vmem:[#allocation12 + $0xa8] sm:$0xff]  ;;  %v813_v49 = vld [vmem:[#allocation12 + $0xa0] sm:$0xff]  ;;  %v289_v38 = vshrl.u32 %v288_v37, 7  ;;  %vm902_vm14 = vcmask 1044484  }
  0x25   :  { %164 = vmatpush.msra.mxu0 %v141_v4  ;;  %886 = vst [vmem:[%s1452_s7 + $0x20] sm:$0xff] %v1196_v39  ;;  %v812_v50 = vld [vmem:[#allocation12 + $0x98] sm:$0xff]  ;;  %v811_v51 = vld [vmem:[#allocation12 + $0x90] sm:$0xff]  ;;  %v810_v52 = vld [vmem:[#allocation12 + $0x88] sm:$0xff]  ;;  %vm904_vm15 = vcmask 1045509  }
  0x26   :  { %269 = vmatpush.msra.mxu2 %v248_v40  ;;  %822 = vmatpush.msra.mxu3 %v817_v45  ;;  %v809_v53 = vld [vmem:[#allocation12 + $0x80] sm:$0xff]  ;;  %v808_v54 = vld [vmem:[#allocation12 + $0x78] sm:$0xff]  ;;  %v807_v55 = vld [vmem:[#allocation12 + $0x70] sm:$0xff] }
  0x27   :  { %187 = vmatpush.msrb.mxu0 %v140_v5  ;;  %v137_v7 = vld [vmem:[#allocation2] sm:$0xff]  ;;  %v806_v57 = vld [vmem:[#allocation12 + $0x68] sm:$0xff]  ;;  %v805_v59 = vld [vmem:[#allocation12 + $0x60] sm:$0xff]  ;;  %960 = vset.pattern.permute.xlu1 %v289_v38 }
  0x28   :  { %939 = vmatmul.msk.f32.vlgmr.msra.gmra.mxu0 %vm132_vm0, %v137_v7  ;;  %270 = vmatpush.msra.mxu2 %v247_v41  ;;  %v804_v60 = vld [vmem:[#allocation12 + $0x58] sm:$0xff]  ;;  %v803_v61 = vld [vmem:[#allocation12 + $0x50] sm:$0xff]  ;;  %v859_v62 = vld [vmem:[#allocation12 + $0x148] sm:$0xff] }
  0x29   :  { %188 = vmatpush.msrb.mxu0 %v139_v6  ;;  %v138_v16 = vld [vmem:[#allocation3] sm:$0xff]  ;;  %823 = vmatpush.msra.mxu3 %v816_v46  ;;  %v857_v0 = vld [vmem:[#allocation12 + $0x138] sm:$0xff]  ;;  %v856_v1 = vld [vmem:[#allocation12 + $0x130] sm:$0xff] }
  0x2a   :  { %v858_v63 = vld [vmem:[#allocation12 + $0x140] sm:$0xff]  ;;  %862 = vmatpush.msra.mxu1 %v859_v62  ;;  %v989_v2 = vld [vmem:[#allocation14 + $0x1] ss:$0 sm:$0xff]  ;;  %v855_v9 = vld [vmem:[#allocation12 + $0x128] sm:$0xff]  ;;  %959 = vset.pattern.permute.xlu0 %v289_v38 }
  0x2b   :  { %824 = vmatpush.msra.mxu3 %v815_v47  ;;  %958 = vset.pattern.permute.xlu2 %v289_v38  ;;  %v991_v39 = vld [vmem:[#allocation14 + $0x3] ss:$0 sm:$0xff] }
  0x2c   :  { %863 = vmatpush.msra.mxu1 %v858_v63 }
  0x2d   :  { %825 = vmatpush.msra.mxu3 %v814_v48 }
  0x2e   :  { %864 = vmatpush.msra.mxu1 %v857_v0 }
  0x2f   :  { %826 = vmatpush.msra.mxu3 %v813_v49 }
  0x30   :  { %940 = vmatmul.msk.f32.vlgmr.msrb.gmra.mxu0 %vm169_vm1, %v136_v8  ;;  %865 = vmatpush.msra.mxu1 %v856_v1  ;;  %vm906_vm1 = vcmask 1046534  }
  0x31   :  { %827 = vmatpush.msra.mxu3 %v812_v50 }
  0x32   :  { %866 = vmatpush.msra.mxu1 %v855_v9 }
  0x33   :  { %828 = vmatpush.msra.mxu3 %v811_v51 }
  0x35   :  { %829 = vmatpush.msra.mxu3 %v810_v52  ;;  %v1299_v52 = vadd.s32 12, %v289_v38 }
  0x37   :  { %830 = vmatpush.msra.mxu3 %v809_v53  ;;  %v1301_v53 = vadd.s32 4, %v289_v38 }
  0x39   :  { %831 = vmatpush.msra.mxu3 %v808_v54 }
  0x3b   :  { %832 = vmatpush.msra.mxu3 %v807_v55 }
  0x3d   :  { %833 = vmatpush.msra.mxu3 %v806_v57 }
  0x3f   :  { %834 = vmatpush.msra.mxu3 %v805_v59 }
  0x41   :  { %835 = vmatpush.msra.mxu3 %v804_v60  ;;  %v1310_v60 = vadd.s32 28, %v289_v38 }
  0x43   :  { %836 = vmatpush.msra.mxu3 %v803_v61  ;;  %v1312_v61 = vadd.s32 20, %v289_v38 }
  0xa5   :  { %v166_v10 = vpop.f32.mrf.mxu0 }
  0xad   :  { %v190_v12 = vpop.f32.mrf.mxu0 }
  0xae   :  { %v191_v13 = vadd.f32 %v190_v12, %v166_v10  ;;  %v854_v10 = vld [vmem:[#allocation12 + $0x120] sm:$0xff]  ;;  %v852_v12 = vld [vmem:[#allocation12 + $0x110] sm:$0xff] }
  0xaf   :  { %867 = vmatpush.msra.mxu1 %v854_v10 }
  0xb0   :  { %v195_v14 = vadd.f32 %v988_v11, %v191_v13  ;;  %v853_v11 = vld [vmem:[#allocation12 + $0x118] sm:$0xff]  ;;  %v851_v13 = vld [vmem:[#allocation12 + $0x108] sm:$0xff] }
  0xb1   :  { %868 = vmatpush.msra.mxu1 %v853_v11 }
  0xb2   :  { %992 = vtanh.f32 %v195_v14  ;;  %v941_v17 = vmul.f32 -1.442695, %v195_v14  ;;  %v850_v14 = vld [vmem:[#allocation12 + $0x100] sm:$0xff] }
  0xb3   :  { %869 = vmatpush.msra.mxu1 %v852_v12  ;;  %v349_v12 = vld [vmem:[#allocation9 + $0x18] sm:$0xf] }
  0xb4   :  { %994 = vpow2.f32 %v941_v17  ;;  %v847_v17 = vld [vmem:[#allocation12 + $0xe8] sm:$0xff] }
  0xb5   :  { %870 = vmatpush.msra.mxu1 %v851_v13 }
  0xb7   :  { %871 = vmatpush.msra.mxu1 %v850_v14 }
  0xb8   :  { %v993_v15 = vpop.eup %992 }
  0xb9   :  { %222 = vrot.lane.b32.xlu0 %v993_v15, %s1186_s11  ;;  %v849_v15 = vld [vmem:[#allocation12 + $0xf8] sm:$0xff] }
  0xba   :  { %v995_v18 = vpop.eup %994  ;;  %872 = vmatpush.msra.mxu1 %v849_v15 }
  0xbb   :  { %v199_v19 = vadd.f32 1.0, %v995_v18  ;;  %v846_v18 = vld [vmem:[#allocation12 + $0xe0] sm:$0xff] }
  0xbd   :  { %996 = vrcp.f32 %v199_v19  ;;  %v211_v25 = vand.u32 2147483648, %v199_v19  ;;  %vm205_vm3 = vweird.f32 %v199_v19  ;;  %v209_v26 = vand.u32 2147483647, %v199_v19 }
  0xbf   :  { %v212_v28 = vor.u32 1.1754944e-38, %v211_v25  ;;  %vm210_vm5 = vcmp.eq.f32.partialorder %v209_v26, 8.507059e+37  ;;  %v990_v25 = vld [vmem:[#allocation14 + $0x2] ss:$0 sm:$0xff] }
  0xc1   :  { %217 = vrot.lane.b32.xlu0 %v138_v16, %s1195_s4  ;;  %v848_v16 = vld [vmem:[#allocation12 + $0xf0] sm:$0xff] }
  0xc2   :  { %873 = vmatpush.msra.mxu1 %v848_v16  ;;  %v350_v16 = vld [vmem:[#allocation9 + $0x1c] sm:$0xf] }
  0xc3   :  { %v997_v20 = vpop.eup %996 }
  0xc4   :  { %v201_v21 = vmul.f32 %v997_v20, %v199_v19  ;;  %vm206_vm2 = vweird.f32 %v997_v20  ;;  %874 = vmatpush.msra.mxu1 %v847_v17  ;;  %v845_v19 = vld [vmem:[#allocation12 + $0xd8] sm:$0xff] }
  0xc5   :  { %vm207_vm4 = vmor %vm205_vm3, %vm206_vm2  ;;  %vm908_vm2 = vcmask 1047559  }
  0xc6   :  { %v202_v22 = vsub.f32 1.0, %v201_v21  ;;  %875 = vmatpush.msra.mxu1 %v846_v18 }
  0xc8   :  { %v203_v23 = vmul.f32 %v997_v20, %v202_v22  ;;  %876 = vmatpush.msra.mxu1 %v845_v19 }
  0xca   :  { %v204_v24 = vadd.f32 %v997_v20, %v203_v23 }
  0xcc   :  { %v208_v27 = vsel %vm207_vm4, %v997_v20, %v204_v24  ;;  %v844_v20 = vld [vmem:[#allocation12 + $0xd0] sm:$0xff] }
  0xcd   :  { %v213_v30 = vsel %vm210_vm5, %v212_v28, %v208_v27  ;;  %877 = vmatpush.msra.mxu1 %v844_v20 }
 0x12b   :  { %v223_v29 = vpop.permute.xlu0 %222 }
 0x12c   :  { %v225_v31 = vmul.f32 %v223_v29, %v213_v30 }
 0x12e   :  { %227 = vrot.lane.b32.xlu1 %v225_v31, %s1195_s4 }
 0x133   :  { %v218_v32 = vpop.permute.xlu0 %217 }
 0x134   :  { %v220_v33 = vmul.f32 %v218_v32, %v213_v30 }
 0x1a0   :  { %v228_v34 = vpop.permute.xlu1 %227 }
 0x1a1   :  { %v230_v35 = vadd.f32 %v228_v34, %v220_v33 }
 0x1a3   :  { %998 = vtanh.f32 %v230_v35 }
 0x1a9   :  { %v999_v36 = vpop.eup %998 }
 0x1aa   :  { %233 = vrot.lane.b32.xlu1 %v999_v36, %s1186_s11 }
 0x21c   :  { %v234_v42 = vpop.permute.xlu1 %233 }
 0x21d   :  { %v236_v43 = vmul.f32 %v234_v42, %v213_v30 }
 0x21f   :  { %238 = vrot.lane.b32.xlu2 %v236_v43, %s1195_s4 }
 0x227   :  { %243 = vrot.lane.b32.xlu2 %v230_v35, %s1197_s3 }
 0x279   :  { %v239_v56 = vpop.permute.xlu2 %238 }
 0x27a   :  { %241 = vst.msk [vmem:[#allocation2] sm:$0xff] %vm132_vm0, %v239_v56  ;;  %942 = vmatmul.msk.f32.vlgmr.msra.gmra.mxu2 %vm132_vm0, %v239_v56 }
 0x27b   :  { %929 = vst.msk [vmem:[%s1452_s7 + $0x18] sm:$0xff] %vm132_vm0, %v239_v56 }
 0x281   :  { %v244_v58 = vpop.permute.xlu2 %243 }
 0x282   :  { %246 = vst.msk [vmem:[#allocation3] sm:$0xff] %vm132_vm0, %v244_v58 }
 0x283   :  { %930 = vst.msk [vmem:[%s1452_s7 + $0x20] sm:$0xff] %vm132_vm0, %v244_v58 }
 0x2fd   :  { %v272_v3 = vpop.f32.mrf.mxu2 }
 0x2fe   :  { %v273_v4 = vadd.f32 %v989_v2, %v272_v3  ;;  %v344_v3 = vld [vmem:[#allocation9 + $0x4] sm:$0xf] }
 0x300   :  { %v417_v5 = vsel %vm416_vm6, %v273_v4, -inf  ;;  %v276_v6 = vsel %vm275_vm7, %v273_v4, -inf  ;;  %vm800_vm8 = vcmp.gt.f32.partialorder %v273_v4, 0.0  ;;  %v801_v7 = vmul.f32 0.01, %v273_v4 }
 0x301   :  { %418 = vmax.xlane.f32.xlu2 %v417_v5  ;;  %277 = vmax.xlane.f32.xlu0 %v276_v6  ;;  %v343_v5 = vld [vmem:[#allocation9] sm:$0xf] }
 0x302   :  { %v802_v8 = vsel %vm800_vm8, %v273_v4, %v801_v7 }
 0x303   :  { %837 = vmatmul.f32.vlgmr.msra.gmra.mxu3 %v802_v8  ;;  %v346_v8 = vld [vmem:[#allocation9 + $0xc] sm:$0xf] }
 0x374   :  { %v419_v21 = vpop.xlane.xlu2 %418  ;;  %v278_v30 = vpop.xlane.xlu0 %277 }
 0x375   :  { %v420_v22 = vsub.f32 %v273_v4, %v419_v21  ;;  %v279_v31 = vsub.f32 %v273_v4, %v278_v30  ;;  %v345_v4 = vld [vmem:[#allocation9 + $0x8] sm:$0xf] }
 0x377   :  { %v421_v23 = vmul.f32 1.442695, %v420_v22  ;;  %v280_v32 = vmul.f32 1.442695, %v279_v31 }
 0x379   :  { %1000 = vpow2.f32 %v421_v23 }
 0x37a   :  { %1002 = vpow2.f32 %v280_v32 }
 0x37f   :  { %v1001_v24 = vpop.eup %1000 }
 0x380   :  { %424 = vrot.lane.b32.xlu1 %v1001_v24, %s1198_s22  ;;  %v1003_v33 = vpop.eup %1002 }
 0x381   :  { %v282_v34 = vsel %vm275_vm7, %v1003_v33, 0.0 }
 0x386   :  { %v838_v26 = vpop.f32.mrf.mxu3 }
 0x387   :  { %v839_v27 = vadd.f32 %v990_v25, %v838_v26 }
 0x389   :  { %vm841_vm9 = vcmp.gt.f32.partialorder %v839_v27, 0.0  ;;  %v842_v28 = vmul.f32 0.01, %v839_v27 }
 0x38b   :  { %v843_v29 = vsel %vm841_vm9, %v839_v27, %v842_v28  ;;  %v347_v27 = vld [vmem:[#allocation9 + $0x10] sm:$0xf] }
 0x38c   :  { %878 = vmatmul.f32.vlgmr.msra.gmra.mxu1 %v843_v29 }
 0x3aa   :  { %283 = vadd.xlane.f32.xlu1 %v282_v34 }
 0x3f2   :  { %v425_v35 = vpop.permute.xlu1 %424 }
 0x3f3   :  { %v427_v36 = vsel %vm132_vm0, %v425_v35, 0.0 }
 0x3f4   :  { %428 = vadd.xlane.f32.xlu1 %v427_v36 }
 0x409   :  { %v879_v40 = vpop.f32.mrf.mxu1 }
 0x40a   :  { %v880_v41 = vadd.f32 %v991_v39, %v879_v40 }
 0x40c   :  { %887 = vst [vmem:[%s1452_s7] sm:$0xff] %v880_v41 }
 0x41d   :  { %v284_v42 = vpop.xlane.xlu1 %283 }
 0x41e   :  { %1004 = vrcp.f32 %v284_v42 }
 0x424   :  { %v1005_v43 = vpop.eup %1004 }
 0x425   :  { %v286_v44 = vmul.f32 %v1005_v43, %v1003_v33 }
 0x427   :  { %v336_v45 = vperm.slane %v286_v44, 7  ;;  %v329_v46 = vperm.slane %v286_v44, 6  ;;  %v287_v47 = vperm.slane %v286_v44, 0  ;;  %v294_v48 = vperm.slane %v286_v44, 1 }
 0x428   :  { %v301_v49 = vperm.slane %v286_v44, 2  ;;  %v308_v50 = vperm.slane %v286_v44, 3  ;;  %v315_v51 = vperm.slane %v286_v44, 4  ;;  %v322_v54 = vperm.slane %v286_v44, 5 }
 0x429   :  { %341 = vperm.xlu1 %960, %v336_v45   ;;  %334 = vperm.xlu0 %959, %v329_v46   ;;  %v348_v45 = vld [vmem:[#allocation9 + $0x14] sm:$0xf] }
 0x42a   :  { %292 = vperm.xlu2 %958, %v287_v47  }
 0x431   :  { %966 = vset.pattern.permute.xlu1 %v1299_v52  ;;  %961 = vset.pattern.permute.xlu0 %v1301_v53 }
 0x432   :  { %299 = vperm.xlu2 %958, %v294_v48  }
 0x43a   :  { %306 = vperm.xlu2 %958, %v301_v49  }
 0x442   :  { %313 = vperm.xlu2 %958, %v308_v50  }
 0x44a   :  { %320 = vperm.xlu2 %958, %v315_v51  }
 0x452   :  { %327 = vperm.xlu2 %958, %v322_v54  }
 0x45a   :  { %962 = vset.pattern.permute.xlu2 %v1299_v52 }
 0x467   :  { %v429_v55 = vpop.xlane.xlu1 %428 }
 0x468   :  { %1006 = vrcp.f32 %v429_v55 }
 0x46e   :  { %v1007_v56 = vpop.eup %1006 }
 0x46f   :  { %v1306_v57 = vmul.f32 %v1007_v56, %v1001_v24 }
 0x471   :  { %v457_v58 = vperm.slane %v1306_v57, 1  ;;  %v432_v59 = vperm.slane %v1306_v57, 0  ;;  %v1318_v62 = vperm.slane %v1306_v57, 2  ;;  %v1325_v1 = vperm.slane %v1306_v57, 3 }
 0x472   :  { %v1336_v24 = vperm.slane %v1306_v57, 4 }
 0x473   :  { %468 = vperm.xlu1 %966, %v457_v58   ;;  %443 = vperm.xlu2 %962, %v432_v59  }
 0x474   :  { %437 = vperm.xlu0 %961, %v432_v59  }
 0x47b   :  { %971 = vset.pattern.permute.xlu1 %v1310_v60  ;;  %964 = vset.pattern.permute.xlu2 %v1310_v60 }
 0x47c   :  { %963 = vset.pattern.permute.xlu0 %v1312_v61 }
 0x483   :  { %505 = vperm.xlu1 %971, %v1318_v62   ;;  %455 = vperm.xlu2 %964, %v432_v59  }
 0x484   :  { %v293_v63 = vpop.permute.xlu2 %292  ;;  %449 = vperm.xlu0 %963, %v432_v59  }
 0x485   :  { %v351_v9 = vmul.f32 %v343_v5, %v293_v63 }
 0x487   :  { %v360_v18 = vsel %vm359_vm10, %v351_v9, 0.0 }
 0x488   :  { %v361_v25 = vrot.slane %v360_v18, 4 }
 0x48a   :  { %v362_v34 = vadd.f32 %v361_v25, %v360_v18 }
 0x48b   :  { %973 = vset.pattern.permute.xlu1 %v1299_v52  ;;  %967 = vset.pattern.permute.xlu2 %v1312_v61 }
 0x48c   :  { %v300_v0 = vpop.permute.xlu2 %299  ;;  %965 = vset.pattern.permute.xlu0 %v1301_v53  ;;  %v363_v42 = vrot.slane %v362_v34, 2 }
 0x48d   :  { %v352_v6 = vmul.f32 %v344_v3, %v300_v0 }
 0x48e   :  { %v364_v55 = vadd.f32 %v363_v42, %v362_v34  ;;  %v632_v34 = vld [vmem:[#allocation11] sm:$0xff] }
 0x48f   :  { %v367_v11 = vsel %vm359_vm10, %v352_v6, 0.0 }
 0x490   :  { %v368_v20 = vrot.slane %v367_v11, 4  ;;  %v365_v5 = vrot.slane %v364_v55, 1 }
 0x492   :  { %v369_v28 = vadd.f32 %v368_v20, %v367_v11 }
 0x493   :  { %518 = vperm.xlu1 %973, %v1325_v1   ;;  %474 = vperm.xlu2 %967, %v457_v58  }
 0x494   :  { %v307_v2 = vpop.permute.xlu2 %306  ;;  %462 = vperm.xlu0 %965, %v457_v58   ;;  %v370_v38 = vrot.slane %v369_v28, 2 }
 0x495   :  { %v353_v7 = vmul.f32 %v345_v4, %v307_v2 }
 0x496   :  { %v371_v47 = vadd.f32 %v370_v38, %v369_v28 }
 0x497   :  { %v374_v15 = vsel %vm359_vm10, %v353_v7, 0.0 }
 0x498   :  { %v375_v22 = vrot.slane %v374_v15, 4  ;;  %v372_v0 = vrot.slane %v371_v47, 1 }
 0x49a   :  { %v376_v31 = vadd.f32 %v375_v22, %v374_v15 }
 0x49b   :  { %976 = vset.pattern.permute.xlu1 %v1301_v53  ;;  %968 = vset.pattern.permute.xlu2 %v1310_v60  ;;  %v335_v13 = vpop.permute.xlu0 %334  ;;  %v342_v17 = vpop.permute.xlu1 %341 }
 0x49c   :  { %v314_v10 = vpop.permute.xlu2 %313  ;;  %487 = vperm.xlu0 %965, %v1318_v62   ;;  %v357_v21 = vmul.f32 %v349_v12, %v335_v13  ;;  %v358_v23 = vmul.f32 %v350_v16, %v342_v17  ;;  %v377_v41 = vrot.slane %v376_v31, 2 }
 0x49d   :  { %v354_v14 = vmul.f32 %v346_v8, %v314_v10  ;;  %v373_v10 = vadd.f32 %v372_v0, %v371_v47 }
 0x49e   :  { %v402_v29 = vsel %vm359_vm10, %v357_v21, 0.0  ;;  %v409_v32 = vsel %vm359_vm10, %v358_v23, 0.0  ;;  %v378_v51 = vadd.f32 %v377_v41, %v376_v31  ;;  %v1365_v31 = vperm.slane %v1306_v57, 5 }
 0x49f   :  { %v381_v19 = vsel %vm359_vm10, %v354_v14, 0.0  ;;  %v403_v36 = vrot.slane %v402_v29, 4  ;;  %v410_v39 = vrot.slane %v409_v32, 4  ;;  %v366_v14 = vadd.f32 %v365_v5, %v364_v55  ;;  %v636_v55 = vld [vmem:[#allocation11 + $0x20] sm:$0xff] }
 0x4a0   :  { %v382_v26 = vrot.slane %v381_v19, 4  ;;  %v379_v4 = vrot.slane %v378_v51, 1 }
 0x4a1   :  { %v404_v46 = vadd.f32 %v403_v36, %v402_v29  ;;  %v411_v48 = vadd.f32 %v410_v39, %v409_v32  ;;  %v1371_v32 = vperm.slane %v1306_v57, 6  ;;  %v634_v39 = vld [vmem:[#allocation11 + $0x10] sm:$0xff] }
 0x4a2   :  { %v383_v35 = vadd.f32 %v382_v26, %v381_v19  ;;  %v380_v13 = vadd.f32 %v379_v4, %v378_v51  ;;  %v897_v19 = vsel %vm896_vm11, %v373_v10, %v366_v14 }
 0x4a3   :  { %537 = vperm.xlu1 %976, %v1336_v24   ;;  %480 = vperm.xlu2 %968, %v457_v58   ;;  %v405_v58 = vrot.slane %v404_v46, 2  ;;  %v412_v2 = vrot.slane %v411_v48, 2 }
 0x4a4   :  { %v321_v30 = vpop.permute.xlu2 %320  ;;  %970 = vset.pattern.permute.xlu0 %v1312_v61  ;;  %v384_v43 = vrot.slane %v383_v35, 2 }
 0x4a5   :  { %v355_v33 = vmul.f32 %v347_v27, %v321_v30  ;;  %v406_v8 = vadd.f32 %v405_v58, %v404_v46  ;;  %v413_v11 = vadd.f32 %v412_v2, %v411_v48 }
 0x4a6   :  { %v385_v56 = vadd.f32 %v384_v43, %v383_v35 }
 0x4a7   :  { %v388_v37 = vsel %vm359_vm10, %v355_v33, 0.0  ;;  %v407_v17 = vrot.slane %v406_v8, 1  ;;  %v414_v20 = vrot.slane %v413_v11, 1  ;;  %v607_v33 = vperm.slane %v1306_v57, 7 }
 0x4a8   :  { %v389_v40 = vrot.slane %v388_v37, 4  ;;  %v386_v6 = vrot.slane %v385_v56, 1 }
 0x4a9   :  { %v408_v25 = vadd.f32 %v407_v17, %v406_v8  ;;  %v415_v27 = vadd.f32 %v414_v20, %v413_v11 }
 0x4aa   :  { %v390_v44 = vadd.f32 %v389_v40, %v388_v37  ;;  %v387_v15 = vadd.f32 %v386_v6, %v385_v56 }
 0x4ab   :  { %978 = vset.pattern.permute.xlu1 %v1312_v61  ;;  %969 = vset.pattern.permute.xlu2 %v1299_v52 }
 0x4ac   :  { %v391_v49 = vrot.slane %v390_v44, 2  ;;  %v328_v50 = vpop.permute.xlu2 %327  ;;  %499 = vperm.xlu0 %970, %v1318_v62  }
 0x4ad   :  { %v356_v54 = vmul.f32 %v348_v45, %v328_v50  ;;  %v637_v50 = vld [vmem:[#allocation11 + $0x28] sm:$0xff] }
 0x4ae   :  { %v392_v59 = vadd.f32 %v391_v49, %v390_v44 }
 0x4af   :  { %v395_v63 = vsel %vm359_vm10, %v356_v54, 0.0  ;;  %v638_v54 = vld [vmem:[#allocation11 + $0x30] sm:$0xff] }
 0x4b0   :  { %v396_v3 = vrot.slane %v395_v63, 4  ;;  %v393_v9 = vrot.slane %v392_v59, 1 }
 0x4b2   :  { %v397_v7 = vadd.f32 %v396_v3, %v395_v63  ;;  %v394_v18 = vadd.f32 %v393_v9, %v392_v59  ;;  %v639_v59 = vld [vmem:[#allocation11 + $0x38] sm:$0xff] }
 0x4b3   :  { %549 = vperm.xlu1 %978, %v1336_v24   ;;  %493 = vperm.xlu2 %969, %v1318_v62   ;;  %v899_v62 = vsel %vm898_vm12, %v380_v13, %v897_v19 }
 0x4b4   :  { %v398_v12 = vrot.slane %v397_v7, 2  ;;  %975 = vset.pattern.permute.xlu0 %v1310_v60  ;;  %v901_v22 = vsel %vm900_vm13, %v387_v15, %v899_v62 }
 0x4b5   :  { %v903_v26 = vsel %vm902_vm14, %v394_v18, %v901_v22 }
 0x4b6   :  { %v399_v16 = vadd.f32 %v398_v12, %v397_v7 }
 0x4b8   :  { %v400_v21 = vrot.slane %v399_v16, 1 }
 0x4ba   :  { %v401_v23 = vadd.f32 %v400_v21, %v399_v16 }
 0x4bb   :  { %981 = vset.pattern.permute.xlu1 %v1299_v52  ;;  %972 = vset.pattern.permute.xlu2 %v1301_v53 }
 0x4bc   :  { %v905_v28 = vsel %vm904_vm15, %v401_v23, %v903_v26  ;;  %530 = vperm.xlu0 %975, %v1325_v1  }
 0x4bd   :  { %v907_v29 = vsel %vm906_vm1, %v408_v25, %v905_v28 }
 0x4be   :  { %v909_v30 = vsel %vm908_vm2, %v415_v27, %v907_v29 }
 0x4bf   :  { %911 = vst.msk [vmem:[%s1452_s7 + $0x8] sm:$0xff] %vm132_vm0, %v909_v30 }
 0x4c3   :  { %568 = vperm.xlu1 %981, %v1365_v31   ;;  %512 = vperm.xlu2 %972, %v1325_v1  }
 0x4c4   :  { %980 = vset.pattern.permute.xlu0 %v1301_v53 }
 0x4cb   :  { %593 = vperm.xlu1 %981, %v1371_v32   ;;  %974 = vset.pattern.permute.xlu2 %v1312_v61 }
 0x4cc   :  { %562 = vperm.xlu0 %980, %v1365_v31  }
 0x4cd   :  { %v444_v57 = vpop.permute.xlu2 %443 }
 0x4d3   :  { %618 = vperm.xlu1 %981, %v607_v33   ;;  %524 = vperm.xlu2 %974, %v1325_v1   ;;  %v633_v1 = vld [vmem:[#allocation11 + $0x8] sm:$0xff] }
 0x4d4   :  { %612 = vperm.xlu0 %980, %v607_v33   ;;  %v665_v37 = vmul.f32 %v633_v1, %v444_v57 }
 0x4d6   :  { %v697_v42 = vsel %vm132_vm0, %v665_v37, 0.0  ;;  %v640_v37 = vld [vmem:[#allocation11 + $0x40] sm:$0xff] }
 0x4db   :  { %985 = vset.pattern.permute.xlu1 %v1312_v61  ;;  %977 = vset.pattern.permute.xlu2 %v1299_v52  ;;  %v635_v52 = vld [vmem:[#allocation11 + $0x18] sm:$0xff] }
 0x4dc   :  { %984 = vset.pattern.permute.xlu0 %v1310_v60 }
 0x4dd   :  { %v456_v38 = vpop.permute.xlu2 %455 }
 0x4de   :  { %v667_v43 = vmul.f32 %v635_v52, %v456_v38  ;;  %v644_v52 = vld [vmem:[#allocation11 + $0x60] sm:$0xff]  ;;  %v642_v38 = vld [vmem:[#allocation11 + $0x50] sm:$0xff] }
 0x4e0   :  { %v701_v48 = vsel %vm132_vm0, %v667_v43, 0.0  ;;  %v649_v43 = vld [vmem:[#allocation11 + $0x88] sm:$0xff] }
 0x4e3   :  { %624 = vperm.xlu1 %985, %v607_v33   ;;  %543 = vperm.xlu2 %977, %v1336_v24  }
 0x4e4   :  { %580 = vperm.xlu0 %984, %v1365_v31  }
 0x4e5   :  { %v469_v51 = vpop.permute.xlu1 %468 }
 0x4e6   :  { %v438_v35 = vpop.permute.xlu0 %437  ;;  %v669_v56 = vmul.f32 %v637_v50, %v469_v51 }
 0x4e7   :  { %v664_v36 = vmul.f32 %v632_v34, %v438_v35 }
 0x4e8   :  { %v710_v4 = vsel %vm132_vm0, %v669_v56, 0.0 }
 0x4e9   :  { %v696_v40 = vsel %vm132_vm0, %v664_v36, 0.0 }
 0x4ea   :  { %v698_v45 = vadd.f32 %v697_v42, %v696_v40  ;;  %v648_v42 = vld [vmem:[#allocation11 + $0x80] sm:$0xff] }
 0x4eb   :  { %987 = vset.pattern.permute.xlu1 %v1310_v60  ;;  %979 = vset.pattern.permute.xlu2 %v1310_v60 }
 0x4f3   :  { %630 = vperm.xlu1 %987, %v607_v33   ;;  %555 = vperm.xlu2 %979, %v1336_v24   ;;  %v475_v24 = vpop.permute.xlu2 %474 }
 0x4f4   :  { %v670_v2 = vmul.f32 %v638_v54, %v475_v24  ;;  %v653_v24 = vld [vmem:[#allocation11 + $0xa8] sm:$0xff] }
 0x4f5   :  { %v506_v62 = vpop.permute.xlu1 %505 }
 0x4f6   :  { %v450_v41 = vpop.permute.xlu0 %449  ;;  %v712_v8 = vsel %vm132_vm0, %v670_v2, 0.0 }
 0x4f7   :  { %v666_v44 = vmul.f32 %v634_v39, %v450_v41  ;;  %v645_v39 = vld [vmem:[#allocation11 + $0x68] sm:$0xff] }
 0x4f9   :  { %v699_v46 = vsel %vm132_vm0, %v666_v44, 0.0 }
 0x4fa   :  { %v700_v47 = vadd.f32 %v699_v46, %v698_v45  ;;  %v646_v46 = vld [vmem:[#allocation11 + $0x70] sm:$0xff] }
 0x4fb   :  { %982 = vset.pattern.permute.xlu2 %v1301_v53 }
 0x4fc   :  { %v702_v49 = vadd.f32 %v701_v48, %v700_v47  ;;  %v652_v47 = vld [vmem:[#allocation11 + $0xa0] sm:$0xff] }
 0x4fd   :  { %v481_v63 = vpop.permute.xlu2 %480 }
 0x4fe   :  { %v703_v58 = vrot.slane %v702_v49, 4  ;;  %v671_v5 = vmul.f32 %v639_v59, %v481_v63  ;;  %v643_v59 = vld [vmem:[#allocation11 + $0x58] sm:$0xff] }
 0x500   :  { %v704_v6 = vadd.f32 %v703_v58, %v702_v49  ;;  %v714_v10 = vsel %vm132_vm0, %v671_v5, 0.0  ;;  %v654_v58 = vld [vmem:[#allocation11 + $0xb0] sm:$0xff] }
 0x502   :  { %v705_v11 = vrot.slane %v704_v6, 2 }
 0x503   :  { %587 = vperm.xlu2 %982, %v1371_v32  }
 0x504   :  { %v706_v14 = vadd.f32 %v705_v11, %v704_v6  ;;  %v650_v6 = vld [vmem:[#allocation11 + $0x90] sm:$0xff] }
 0x505   :  { %v519_v22 = vpop.permute.xlu1 %518 }
 0x506   :  { %v463_v0 = vpop.permute.xlu0 %462  ;;  %v707_v17 = vrot.slane %v706_v14, 1  ;;  %v677_v49 = vmul.f32 %v645_v39, %v519_v22 }
 0x507   :  { %v668_v3 = vmul.f32 %v636_v55, %v463_v0 }
 0x508   :  { %v708_v20 = vadd.f32 %v707_v17, %v706_v14  ;;  %v736_v11 = vsel %vm132_vm0, %v677_v49, 0.0  ;;  %v660_v14 = vld [vmem:[#allocation11 + $0xe0] sm:$0xff] }
 0x509   :  { %v709_v53 = vsel %vm132_vm0, %v668_v3, 0.0 }
 0x50a   :  { %v711_v7 = vadd.f32 %v710_v4, %v709_v53 }
 0x50b   :  { %983 = vset.pattern.permute.xlu2 %v1312_v61 }
 0x50c   :  { %v713_v9 = vadd.f32 %v712_v8, %v711_v7  ;;  %v647_v7 = vld [vmem:[#allocation11 + $0x78] sm:$0xff] }
 0x50d   :  { %v494_v23 = vpop.permute.xlu2 %493  ;;  %v651_v8 = vld [vmem:[#allocation11 + $0x98] sm:$0xff] }
 0x50e   :  { %v715_v12 = vadd.f32 %v714_v10, %v713_v9  ;;  %v488_v27 = vpop.permute.xlu0 %487  ;;  %v675_v10 = vmul.f32 %v643_v59, %v506_v62  ;;  %v655_v62 = vld [vmem:[#allocation11 + $0xb8] sm:$0xff] }
 0x50f   :  { %v672_v41 = vmul.f32 %v640_v37, %v488_v27  ;;  %v663_v37 = vld [vmem:[#allocation11 + $0xf8] sm:$0xff] }
 0x510   :  { %v716_v13 = vrot.slane %v715_v12, 4 }
 0x511   :  { %v722_v51 = vsel %vm132_vm0, %v672_v41, 0.0 }
 0x512   :  { %v717_v15 = vadd.f32 %v716_v13, %v715_v12 }
 0x513   :  { %574 = vperm.xlu2 %983, %v1365_v31  }
 0x514   :  { %v718_v16 = vrot.slane %v717_v15, 2 }
 0x515   :  { %v538_v25 = vpop.permute.xlu1 %537 }
 0x516   :  { %v719_v18 = vadd.f32 %v718_v16, %v717_v15  ;;  %v680_v54 = vmul.f32 %v648_v42, %v538_v25  ;;  %v661_v15 = vld [vmem:[#allocation11 + $0xe8] sm:$0xff] }
 0x518   :  { %v720_v19 = vrot.slane %v719_v18, 1  ;;  %v748_v12 = vsel %vm132_vm0, %v680_v54, 0.0 }
 0x51a   :  { %v721_v21 = vadd.f32 %v720_v19, %v719_v18 }
 0x51b   :  { %599 = vperm.xlu2 %983, %v1371_v32  }
 0x51c   :  { %v1400_v61 = vsel %vm896_vm11, %v721_v21, %v708_v20 }
 0x51d   :  { %v513_v26 = vpop.permute.xlu2 %512 }
 0x51e   :  { %v500_v30 = vpop.permute.xlu0 %499  ;;  %v676_v44 = vmul.f32 %v644_v52, %v513_v26  ;;  %v662_v26 = vld [vmem:[#allocation11 + $0xf0] sm:$0xff] }
 0x51f   :  { %v674_v45 = vmul.f32 %v642_v38, %v500_v30 }
 0x520   :  { %v735_v3 = vsel %vm132_vm0, %v676_v44, 0.0 }
 0x521   :  { %v725_v4 = vsel %vm132_vm0, %v674_v45, 0.0  ;;  %v737_v16 = vadd.f32 %v736_v11, %v735_v3 }
 0x523   :  { %986 = vset.pattern.permute.xlu2 %v1310_v60  ;;  %v641_v60 = vld [vmem:[#allocation11 + $0x48] sm:$0xff] }
 0x524   :  { %v673_v40 = vmul.f32 %v641_v60, %v494_v23 }
 0x525   :  { %v550_v28 = vpop.permute.xlu1 %549 }
 0x526   :  { %v723_v50 = vsel %vm132_vm0, %v673_v40, 0.0  ;;  %v682_v20 = vmul.f32 %v650_v6, %v550_v28 }
 0x527   :  { %v724_v53 = vadd.f32 %v723_v50, %v722_v51  ;;  %v656_v51 = vld [vmem:[#allocation11 + $0xc0] sm:$0xff] }
 0x528   :  { %v751_v39 = vsel %vm132_vm0, %v682_v20, 0.0 }
 0x529   :  { %v726_v17 = vadd.f32 %v725_v4, %v724_v53 }
 0x52b   :  { %605 = vperm.xlu2 %986, %v1371_v32  }
 0x52d   :  { %v525_v29 = vpop.permute.xlu2 %524 }
 0x52e   :  { %v531_v57 = vpop.permute.xlu0 %530  ;;  %v678_v63 = vmul.f32 %v646_v46, %v525_v29 }
 0x52f   :  { %v679_v21 = vmul.f32 %v647_v7, %v531_v57 }
 0x530   :  { %v738_v18 = vsel %vm132_vm0, %v678_v63, 0.0  ;;  %v658_v63 = vld [vmem:[#allocation11 + $0xd0] sm:$0xff] }
 0x535   :  { %v569_v31 = vpop.permute.xlu1 %568 }
 0x536   :  { %v685_v5 = vmul.f32 %v653_v24, %v569_v31 }
 0x538   :  { %v762_v22 = vsel %vm132_vm0, %v685_v5, 0.0 }
 0x53d   :  { %v544_v33 = vpop.permute.xlu2 %543  ;;  %v1404_v34 = vpop.permute.xlu1 %593 }
 0x53e   :  { %v563_v1 = vpop.permute.xlu0 %562  ;;  %v681_v55 = vmul.f32 %v649_v43, %v544_v33  ;;  %v727_v33 = vsel %vm132_vm0, %v675_v10, 0.0 }
 0x53f   :  { %v684_v0 = vmul.f32 %v652_v47, %v563_v1  ;;  %v739_v1 = vadd.f32 %v738_v18, %v737_v16  ;;  %v728_v38 = vadd.f32 %v727_v33, %v726_v17 }
 0x540   :  { %v749_v13 = vsel %vm132_vm0, %v681_v55, 0.0 }
 0x541   :  { %v761_v19 = vsel %vm132_vm0, %v684_v0, 0.0  ;;  %v750_v27 = vadd.f32 %v749_v13, %v748_v12  ;;  %v729_v50 = vrot.slane %v728_v38, 4  ;;  %v659_v13 = vld [vmem:[#allocation11 + $0xd8] sm:$0xff] }
 0x542   :  { %v763_v60 = vadd.f32 %v762_v22, %v761_v19 }
 0x543   :  { %v752_v43 = vadd.f32 %v751_v39, %v750_v27  ;;  %v730_v5 = vadd.f32 %v729_v50, %v728_v38 }
 0x545   :  { %v619_v36 = vpop.permute.xlu1 %618  ;;  %v731_v12 = vrot.slane %v730_v5, 2 }
 0x546   :  { %v613_v48 = vpop.permute.xlu0 %612  ;;  %v693_v30 = vmul.f32 %v661_v15, %v619_v36 }
 0x547   :  { %v692_v29 = vmul.f32 %v660_v14, %v613_v48 }
 0x548   :  { %v788_v42 = vsel %vm132_vm0, %v693_v30, 0.0 }
 0x549   :  { %v787_v36 = vsel %vm132_vm0, %v692_v29, 0.0 }
 0x54a   :  { %v789_v49 = vadd.f32 %v788_v42, %v787_v36 }
 0x54d   :  { %v556_v35 = vpop.permute.xlu2 %555 }
 0x54e   :  { %v683_v23 = vmul.f32 %v651_v8, %v556_v35  ;;  %v740_v35 = vsel %vm132_vm0, %v679_v21, 0.0 }
 0x54f   :  { %v741_v45 = vadd.f32 %v740_v35, %v739_v1 }
 0x550   :  { %v753_v40 = vsel %vm132_vm0, %v683_v23, 0.0 }
 0x551   :  { %v754_v46 = vadd.f32 %v753_v40, %v752_v43  ;;  %v742_v55 = vrot.slane %v741_v45, 4 }
 0x553   :  { %v755_v59 = vrot.slane %v754_v46, 4  ;;  %v743_v53 = vadd.f32 %v742_v55, %v741_v45 }
 0x555   :  { %v625_v56 = vpop.permute.xlu1 %624  ;;  %v756_v8 = vadd.f32 %v755_v59, %v754_v46  ;;  %v744_v14 = vrot.slane %v743_v53, 2 }
 0x556   :  { %v581_v25 = vpop.permute.xlu0 %580  ;;  %v694_v57 = vmul.f32 %v662_v26, %v625_v56 }
 0x557   :  { %v687_v28 = vmul.f32 %v655_v62, %v581_v25  ;;  %v745_v23 = vadd.f32 %v744_v14, %v743_v53 }
 0x558   :  { %v790_v48 = vsel %vm132_vm0, %v694_v57, 0.0 }
 0x559   :  { %v766_v47 = vsel %vm132_vm0, %v687_v28, 0.0  ;;  %v791_v56 = vadd.f32 %v790_v48, %v789_v49  ;;  %v746_v33 = vrot.slane %v745_v23, 1 }
 0x55b   :  { %v747_v57 = vadd.f32 %v746_v33, %v745_v23 }
 0x55d   :  { %v1406_v32 = vpop.permute.xlu2 %587 }
 0x565   :  { %v631_v52 = vpop.permute.xlu1 %630 }
 0x566   :  { %v695_v44 = vmul.f32 %v663_v37, %v631_v52 }
 0x568   :  { %v792_v54 = vsel %vm132_vm0, %v695_v44, 0.0 }
 0x569   :  { %v793_v3 = vadd.f32 %v792_v54, %v791_v56 }
 0x56b   :  { %v794_v10 = vrot.slane %v793_v3, 4 }
 0x56d   :  { %v575_v2 = vpop.permute.xlu2 %574  ;;  %v795_v19 = vadd.f32 %v794_v10, %v793_v3 }
 0x56e   :  { %v686_v9 = vmul.f32 %v654_v58, %v575_v2  ;;  %v657_v58 = vld [vmem:[#allocation11 + $0xc8] sm:$0xff]  ;;  %v688_v2 = vmul.f32 %v656_v51, %v1406_v32  ;;  %v757_v32 = vrot.slane %v756_v8, 2 }
 0x56f   :  { %v689_v6 = vmul.f32 %v657_v58, %v1404_v34  ;;  %v732_v34 = vadd.f32 %v731_v12, %v730_v5  ;;  %v796_v27 = vrot.slane %v795_v19, 2 }
 0x570   :  { %v764_v31 = vsel %vm132_vm0, %v686_v9, 0.0  ;;  %v774_v9 = vsel %vm132_vm0, %v688_v2, 0.0  ;;  %v758_v25 = vadd.f32 %v757_v32, %v756_v8 }
 0x571   :  { %v765_v41 = vadd.f32 %v764_v31, %v763_v60  ;;  %v775_v15 = vsel %vm132_vm0, %v689_v6, 0.0  ;;  %v733_v30 = vrot.slane %v732_v34, 1  ;;  %v797_v37 = vadd.f32 %v796_v27, %v795_v19 }
 0x572   :  { %v776_v17 = vadd.f32 %v775_v15, %v774_v9  ;;  %v759_v1 = vrot.slane %v758_v25, 1 }
 0x573   :  { %v767_v24 = vadd.f32 %v766_v47, %v765_v41  ;;  %v734_v38 = vadd.f32 %v733_v30, %v732_v34  ;;  %v798_v40 = vrot.slane %v797_v37, 1 }
 0x574   :  { %v760_v39 = vadd.f32 %v759_v1, %v758_v25 }
 0x575   :  { %v600_v0 = vpop.permute.xlu2 %599  ;;  %v768_v4 = vrot.slane %v767_v24, 4  ;;  %v921_v36 = vsel %vm898_vm12, %v734_v38, %v1400_v61  ;;  %v799_v46 = vadd.f32 %v798_v40, %v797_v37 }
 0x576   :  { %v690_v7 = vmul.f32 %v658_v63, %v600_v0  ;;  %v922_v43 = vsel %vm900_vm13, %v747_v57, %v921_v36 }
 0x577   :  { %v769_v11 = vadd.f32 %v768_v4, %v767_v24  ;;  %v923_v44 = vsel %vm902_vm14, %v760_v39, %v922_v43 }
 0x578   :  { %v777_v16 = vsel %vm132_vm0, %v690_v7, 0.0 }
 0x579   :  { %v770_v20 = vrot.slane %v769_v11, 2  ;;  %v778_v22 = vadd.f32 %v777_v16, %v776_v17 }
 0x57b   :  { %v771_v29 = vadd.f32 %v770_v20, %v769_v11 }
 0x57d   :  { %v772_v52 = vrot.slane %v771_v29, 1 }
 0x57f   :  { %v773_v41 = vadd.f32 %v772_v52, %v771_v29 }
 0x581   :  { %v924_v47 = vsel %vm904_vm15, %v773_v41, %v923_v44 }
 0x585   :  { %v606_v18 = vpop.permute.xlu2 %605 }
 0x586   :  { %v691_v21 = vmul.f32 %v659_v13, %v606_v18 }
 0x588   :  { %v779_v62 = vsel %vm132_vm0, %v691_v21, 0.0 }
 0x589   :  { %v780_v26 = vadd.f32 %v779_v62, %v778_v22 }
 0x58b   :  { %v781_v31 = vrot.slane %v780_v26, 4 }
 0x58d   :  { %v782_v60 = vadd.f32 %v781_v31, %v780_v26 }
 0x58f   :  { %v783_v28 = vrot.slane %v782_v60, 2 }
 0x591   :  { %v784_v35 = vadd.f32 %v783_v28, %v782_v60 }
 0x593   :  { %v785_v42 = vrot.slane %v784_v35, 1 }
 0x595   :  { %v786_v45 = vadd.f32 %v785_v42, %v784_v35 }
 0x597   :  { %v925_v48 = vsel %vm906_vm1, %v786_v45, %v924_v47 }
 0x598   :  { %v926_v49 = vsel %vm908_vm2, %v799_v46, %v925_v48 }
 0x599   :  { %928 = vst.msk [vmem:[%s1452_s7 + $0x10] sm:$0xff] %vm132_vm0, %v926_v49 }
 0x59a   :  { %935 = vsyncpa [#allocation5], 1 }
 0x59b   :  { %936 = vsyncpa [#allocation7], 1 }
 0x59c   :  { %937 = vsyncpa [#allocation10], 1 }
 0x59d   :  { %938 = vsyncpa [#allocation13], 1 }

</bundles_post_ra>
